<compile_context>
chip_gen: v7x
topology: tpu7x:2x2x1
jax: 0.10.0
libtpu: 0.0.40
codegen_flags: <defaults>
</compile_context>

<pallas_src>
import jax
import jax.numpy as jnp
from jax.experimental import pallas as pl
from jax.experimental.pallas import tpu as pltpu

# ---- problem sizes (small, consistent with an EEG-classification forward) ----
B = 2            # batch
C_EEG = 4        # EEG electrode channels
T = 128          # time samples
K = 3            # temporal conv kernel width ("same" conv, pad 1 each side)
C_FEAT = 128     # encoder hidden feature width (lane-dense)
EMB = 32         # embedding_dim (module arg)
EMB_PAD = 128    # lane-padded embedding width used inside the kernel
NUM_CLASSES = 40  # module arg; classifier head is not applied in forward()


def _eeg_encoder_kernel(patches_ref, wconv_ref, bconv_ref, wproj_ref, bproj_ref,
                        out_ref):
    """Runs exactly once (no grid); the whole working set lives in VMEM.

    patches_ref : (B*T, C_EEG*K)    bf16  im2col patches (channel-major tap order)
    wconv_ref   : (C_EEG*K, C_FEAT) bf16  flattened conv weights (same ordering)
    bconv_ref   : (1, C_FEAT)       f32   conv bias
    wproj_ref   : (C_FEAT, EMB_PAD) bf16  projection weights, zero-padded cols
    bproj_ref   : (1, EMB_PAD)      f32   projection bias, zero-padded
    out_ref     : (B, EMB_PAD)      f32   lane-dense embedding output
    """
    # Temporal conv as one bf16 im2col matmul (f32 accumulate) + bias + ReLU.
    h = jnp.dot(patches_ref[...], wconv_ref[...],
                preferred_element_type=jnp.float32)              # (B*T, C_FEAT)
    h = jnp.maximum(h + bconv_ref[...], 0.0)

    # Global mean-pool over time: free leading-dim split of the (8,128)-tiled f32
    # array followed by an XLU sublane reduction (no pooling matmul, no pool input).
    pooled = h.reshape(B, T, C_FEAT).sum(axis=1) * (1.0 / T)     # (B, C_FEAT) f32

    # Projection to the lane-padded embedding: native bf16 x bf16 MXU push,
    # f32 accumulation.  No f32 upcast of the weight.
    emb = jnp.dot(pooled.astype(jnp.bfloat16), wproj_ref[...],
                  preferred_element_type=jnp.float32) + bproj_ref[...]

    out_ref[...] = emb                                           # (B, EMB_PAD) f32


def prepare_params(params):
    """One-time weight prep, hoisted out of the per-call forward path."""
    # conv_general_dilated_patches emits patches ordered c*K + k (channel-major),
    # so flatten the conv weight (K, C, F) -> (C, K, F) -> (C*K, F) to match.
    wconv = jnp.transpose(params["wconv"], (1, 0, 2)).reshape(C_EEG * K, C_FEAT)
    wproj = jnp.zeros((C_FEAT, EMB_PAD), jnp.bfloat16)
    wproj = wproj.at[:, :EMB].set(params["wproj"].astype(jnp.bfloat16))
    bproj = jnp.zeros((1, EMB_PAD), jnp.float32).at[:, :EMB].set(params["bproj"])
    return {
        "wconv": wconv.astype(jnp.bfloat16),        # (C*K, F) bf16
        "bconv": params["bconv"].astype(jnp.float32),  # (1, F)  f32
        "wproj": wproj,                              # (F, EMB_PAD) bf16
        "bproj": bproj,                              # (1, EMB_PAD) f32
    }


@jax.jit
def eeg_classification_net(eeg, prep):
    """Forward pass. eeg: (B, C_EEG, T) float32 -> (B, EMB) embedding."""
    x = eeg.astype(jnp.float32)

    # Single-op im2col: (B, C_EEG*K, T) with patch index o giving x_pad[c, t + o],
    # i.e. tap offsets {-1, 0, +1} of a "same" conv; channel ordering is c*K + k.
    patches = jax.lax.conv_general_dilated_patches(
        x, filter_shape=(K,), window_strides=(1,), padding=((1, 1),))
    patches = jnp.transpose(patches, (0, 2, 1)).reshape(B * T, C_EEG * K)
    patches = patches.astype(jnp.bfloat16)

    vmem = pl.BlockSpec(memory_space=pltpu.MemorySpace.VMEM)
    out_pad = pl.pallas_call(
        _eeg_encoder_kernel,
        out_shape=jax.ShapeDtypeStruct((B, EMB_PAD), jnp.float32),
        in_specs=[vmem, vmem, vmem, vmem, vmem],
        out_specs=vmem,
    )(patches, prep["wconv"], prep["bconv"], prep["wproj"], prep["bproj"])

    return out_pad[:, :EMB]   # (B, EMB) embedding — matches module.forward()


def _reference(eeg, params):
    """Pure-JAX reference of the same math (bf16-quantized operands, f32 accumulate)."""
    x = eeg.astype(jnp.bfloat16).astype(jnp.float32)                       # (B, C, T)
    wconv = params["wconv"].astype(jnp.bfloat16).astype(jnp.float32)       # (K, C, F)
    wproj = params["wproj"].astype(jnp.bfloat16).astype(jnp.float32)       # (F, EMB)
    bconv, bproj = params["bconv"], params["bproj"]

    xp = jnp.pad(x, ((0, 0), (0, 0), (1, 1)))
    h = jnp.zeros((B, T, C_FEAT), jnp.float32)
    for k in range(K):
        h += jnp.einsum("bct,cf->btf", xp[:, :, k:k + T], wconv[k])
    h = jnp.maximum(h + bconv[0], 0.0)
    pooled = h.mean(axis=1)                                                # (B, F)
    pooled = pooled.astype(jnp.bfloat16).astype(jnp.float32)   # kernel's bf16 MXU feed
    return pooled @ wproj + bproj[0]                                       # (B, EMB)


def init_params(key):
    k1, k2, k3 = jax.random.split(key, 3)
    wconv = jax.random.normal(k1, (K, C_EEG, C_FEAT), jnp.float32)
    wconv = wconv * (2.0 / (K * C_EEG)) ** 0.5                 # kaiming-style scale
    bconv = jnp.zeros((1, C_FEAT), jnp.float32)
    wproj = jax.random.normal(k2, (C_FEAT, EMB), jnp.float32) * (1.0 / C_FEAT) ** 0.5
    bproj = jax.random.normal(k3, (1, EMB), jnp.float32) * 0.01
    return {"wconv": wconv, "bconv": bconv, "wproj": wproj, "bproj": bproj}


if __name__ == "__main__":
    key = jax.random.PRNGKey(0)
    kx, kp = jax.random.split(key)
    eeg = jax.random.normal(kx, (B, C_EEG, T), jnp.float32)    # (batch, channels, time)
    params = init_params(kp)
    prep = prepare_params(params)   # hoisted one-time weight prep

    emb = eeg_classification_net(eeg, prep)
    emb = jax.block_until_ready(emb)
    assert emb.shape == (B, EMB)

    ref = _reference(eeg, params)
    assert jnp.allclose(emb, ref, rtol=1e-2, atol=1e-2), "mismatch vs reference"

    print("KERNEL_OK")
</pallas_src>

<mosaic_0001>
module attributes {stable_mosaic.version = 11 : i64} {
  func.func @_eeg_encoder_kernel(%arg0: memref<256x12xbf16, #tpu.memory_space<vmem>>, %arg1: memref<12x128xbf16, #tpu.memory_space<vmem>>, %arg2: memref<1x128xf32, #tpu.memory_space<vmem>>, %arg3: memref<128x128xbf16, #tpu.memory_space<vmem>>, %arg4: memref<1x128xf32, #tpu.memory_space<vmem>>, %arg5: memref<2x128xf32, #tpu.memory_space<vmem>>) attributes {dimension_semantics = [], scalar_prefetch = 0 : i64, scratch_operands = 0 : i64, tpu.core_type = #tpu.core_type<tc>} {
    %c0 = arith.constant 0 : index
    %c0_0 = arith.constant 0 : index
    %0 = vector.load %arg0[%c0, %c0_0] : memref<256x12xbf16, #tpu.memory_space<vmem>>, vector<256x12xbf16>
    %c0_1 = arith.constant 0 : index
    %c0_2 = arith.constant 0 : index
    %1 = vector.load %arg1[%c0_1, %c0_2] : memref<12x128xbf16, #tpu.memory_space<vmem>>, vector<12x128xbf16>
    %cst = arith.constant dense<0.000000e+00> : vector<256x128xf32>
    %2 = tpu.matmul %0, %1, %cst {dimension_numbers = #tpu.dot_dimension_numbers<[1], [0], [0], [1], [0, 0, 1, 1], [], []>} : vector<256x12xbf16>, vector<12x128xbf16>, vector<256x128xf32> -> vector<256x128xf32>
    %c0_3 = arith.constant 0 : index
    %c0_4 = arith.constant 0 : index
    %3 = vector.load %arg2[%c0_3, %c0_4] : memref<1x128xf32, #tpu.memory_space<vmem>>, vector<1x128xf32>
    %4 = vector.broadcast %3 : vector<1x128xf32> to vector<256x128xf32>
    %5 = arith.addf %2, %4 : vector<256x128xf32>
    %cst_5 = arith.constant 0.000000e+00 : f32
    %6 = vector.broadcast %cst_5 : f32 to vector<256x128xf32>
    %7 = arith.maximumf %5, %6 : vector<256x128xf32>
    %8 = vector.shape_cast %7 : vector<256x128xf32> to vector<2x128x128xf32>
    %cst_6 = arith.constant dense<0.000000e+00> : vector<2x128xf32>
    %9 = vector.multi_reduction <add>, %8, %cst_6 [1] : vector<2x128x128xf32> to vector<2x128xf32>
    %cst_7 = arith.constant 7.812500e-03 : f32
    %10 = vector.broadcast %cst_7 : f32 to vector<2x128xf32>
    %11 = arith.mulf %9, %10 : vector<2x128xf32>
    %12 = arith.truncf %11 : vector<2x128xf32> to vector<2x128xbf16>
    %c0_8 = arith.constant 0 : index
    %c0_9 = arith.constant 0 : index
    %13 = vector.load %arg3[%c0_8, %c0_9] : memref<128x128xbf16, #tpu.memory_space<vmem>>, vector<128x128xbf16>
    %cst_10 = arith.constant dense<0.000000e+00> : vector<2x128xf32>
    %14 = tpu.matmul %12, %13, %cst_10 {dimension_numbers = #tpu.dot_dimension_numbers<[1], [0], [0], [1], [0, 0, 1, 1], [], []>} : vector<2x128xbf16>, vector<128x128xbf16>, vector<2x128xf32> -> vector<2x128xf32>
    %c0_11 = arith.constant 0 : index
    %c0_12 = arith.constant 0 : index
    %15 = vector.load %arg4[%c0_11, %c0_12] : memref<1x128xf32, #tpu.memory_space<vmem>>, vector<1x128xf32>
    %16 = vector.broadcast %15 : vector<1x128xf32> to vector<2x128xf32>
    %17 = arith.addf %14, %16 : vector<2x128xf32>
    %c0_13 = arith.constant 0 : index
    %c0_14 = arith.constant 0 : index
    %18 = vector.load %arg5[%c0_13, %c0_14] : memref<2x128xf32, #tpu.memory_space<vmem>>, vector<2x128xf32>
    tpu.vector_store %arg5[%c0_13, %c0_14], %17 {strides = array<i32>} : memref<2x128xf32, #tpu.memory_space<vmem>>, vector<2x128xf32>,
    return
  }
}

</mosaic_0001>

<bundles_post_ra>
// kernel: eeg_classification_net.1
= control target key start
LH: loop header
LB: loop body
LE: loop exit
PB: predicated region body
PF: predicated region fallthrough
CT: control target
= control target key end

     0   :  { %vm197_vm0 = vcmask 1045504   ;;  %vm148_vm1 = vcmask 97280   ;;  %s926_s0 = inlined_call_operand.vmem [shape: bf16[256,12], index: 0, kind: input, shape index: {}]   ;;  %s927_s1 = inlined_call_operand.vmem [shape: bf16[12,128], index: 1, kind: input, shape index: {}]   ;;  %s928_s2 = inlined_call_operand.vmem [shape: f32[1,128], index: 2, kind: input, shape index: {}]   ;;  %s929_s3 = inlined_call_operand.vmem [shape: bf16[128,128], index: 3, kind: input, shape index: {}]   ;;  %s930_s4 = inlined_call_operand.vmem [shape: f32[1,128], index: 4, kind: input, shape index: {}]   ;;  %s931_s5 = inlined_call_operand.hbm [shape: f32[2,128], index: 5, kind: output, shape index: {}]  }
   0x1   :  { %v701_v0 = vld [vmem:[%s927_s1] sm:$0x3f]   ;;  %v703_v3 = vld [vmem:[%s926_s0 + $0x8] sm:$0xff]   ;;  %v704_v4 = vld [vmem:[%s926_s0 + $0x10] sm:$0xff]  }
   0x2   :  { %v702_v1 = vld [vmem:[%s926_s0] sm:$0xff]   ;;  %697 = vmatprep.subr.msk.bf16.mxu0 %vm197_vm0, %v701_v0  ;;  %v199_v2 = vsel %vm197_vm0, %v701_v0, 0  ;;  %v705_v5 = vld [vmem:[%s926_s0 + $0x18] sm:$0xff]   ;;  %v707_v7 = vld [vmem:[%s926_s0 + $0x28] sm:$0xff]  }
   0x3   :  { %644 = vmatpush3.bf16.msra.mxu0 %v199_v2  ;;  %645 = vmatprep.mubr.msk.bf16.mxu0 %vm148_vm1, %v702_v1  ;;  %v706_v6 = vld [vmem:[%s926_s0 + $0x20] sm:$0xff]   ;;  %v708_v8 = vld [vmem:[%s926_s0 + $0x30] sm:$0xff]  }
   0x6   :  { %646 = vmatmul.mubr.msk.bf16.vlgmr.msra.gmra.mrb[0].mxu0 %vm148_vm1, %v703_v3 }
   0x7   :  { %649 = vmatprep.mubr.msk.bf16.mxu0 %vm148_vm1, %v704_v4 }
   0xe   :  { %650 = vmatmul.mubr.msk.bf16.gmra.mrb[4].mxu0 %vm148_vm1, %v705_v5 }
   0xf   :  { %653 = vmatprep.mubr.msk.bf16.mxu0 %vm148_vm1, %v706_v6 }
  0x16   :  { %654 = vmatmul.mubr.msk.bf16.gmra.mrb[8].mxu0 %vm148_vm1, %v707_v7 }
  0x17   :  { %10 = vsyncpa [#allocation3], 0  ;;  %657 = vmatprep.mubr.msk.bf16.mxu0 %vm148_vm1, %v708_v8  ;;  %v709_v9 = vld [vmem:[%s926_s0 + $0x38] sm:$0xff]   ;;  %v710_v10 = vld [vmem:[%s926_s0 + $0x40] sm:$0xff]   ;;  %v750_v19 = vmov 0.0   ;;  %vm751_vm2 = vmmov 0  }
  0x18   :  { %v711_v11 = vld [vmem:[%s926_s0 + $0x48] sm:$0xff]   ;;  %v712_v12 = vld [vmem:[%s926_s0 + $0x50] sm:$0xff]   ;;  %v713_v13 = vld [vmem:[%s926_s0 + $0x58] sm:$0xff]   ;;  %677 = vmatprep.subr.bf16.mxu1 %v750_v19  ;;  %693 = vmatprep.mubr.msk.bf16.mxu1 %vm751_vm2, %v750_v19  ;;  %vm467_vm3 = vcmask 1041409   ;;  %s752_s17 = smov [#allocation2]  }
  0x19   :  { %v714_v14 = vld [vmem:[%s926_s0 + $0x60] sm:$0xff]   ;;  %v715_v15 = vld [vmem:[%s926_s0 + $0x68] sm:$0xff]   ;;  %v716_v16 = vld [vmem:[%s926_s0 + $0x70] sm:$0xff]   ;;  %s566_s18 = sshll.u32 %s752_s17, 4  ;;  %s567_s18 = int_to_ptr.vmem [resolvable:$true] %s566_s18 }
  0x1a   :  { %v717_v17 = vld [vmem:[%s926_s0 + $0x78] sm:$0xff]   ;;  %v718_v18 = vld [vmem:[%s929_s3] sm:$0xff]   ;;  %v719_v20 = vld [vmem:[%s929_s3 + $0x8] sm:$0xff]   ;;  %s726_s19 = scalar_lea.vmem %s567_s18, 32  ;;  %p731_p1 = scmp.lt.s32.totalorder %s567_s18, %s567_s18 }
  0x1b   :  { %678 = vmatpush3.bf16.msra.mxu1 %v718_v18  ;;  %v720_v21 = vld [vmem:[%s929_s3 + $0x10] sm:$0xff]   ;;  %v721_v22 = vld [vmem:[%s929_s3 + $0x18] sm:$0xff]   ;;  %v722_v23 = vld [vmem:[%s929_s3 + $0x20] sm:$0xff]   ;;  %p727_p0 = scmp.ne.s32.totalorder %s567_s18, %s726_s19  ;;  %p732_p2 = scmp.lt.s32.totalorder %s726_s19, %s726_s19 }
  0x1c   :  { %679 = vmatprep.subr.bf16.mxu1 %v750_v19  ;;  %v723_v24 = vld [vmem:[%s929_s3 + $0x28] sm:$0xff]   ;;  %v724_v25 = vld [vmem:[%s929_s3 + $0x30] sm:$0xff]   ;;  %v725_v26 = vld [vmem:[%s929_s3 + $0x38] sm:$0xff]  }
  0x1d   :  { %v877_v27 = vld [vmem:[%s928_s2] ss:$0 sm:$0xff]  ;;  %p733_p3 = por %p732_p2, %p731_p1 }
  0x1e   :  { %658 = vmatmul.mubr.msk.bf16.gmra.mrb[12].mxu0 %vm148_vm1, %v709_v9 }
  0x1f   :  { %661 = vmatprep.mubr.msk.bf16.mxu0 %vm148_vm1, %v710_v10  ;;  %680 = vmatpush3.bf16.msra.mxu1 %v719_v20  ;;  %p734_p4 = pnand %p733_p3, %p727_p0 }
  0x20   :  { %681 = vmatprep.subr.bf16.mxu1 %v750_v19 }
  0x23   :  { %682 = vmatpush3.bf16.msra.mxu1 %v720_v21 }
  0x24   :  { %683 = vmatprep.subr.bf16.mxu1 %v750_v19 }
  0x26   :  { %662 = vmatmul.mubr.msk.bf16.gmra.mrb[16].mxu0 %vm148_vm1, %v711_v11 }
  0x27   :  { %665 = vmatprep.mubr.msk.bf16.mxu0 %vm148_vm1, %v712_v12  ;;  %684 = vmatpush3.bf16.msra.mxu1 %v721_v22 }
  0x28   :  { %685 = vmatprep.subr.bf16.mxu1 %v750_v19 }
  0x2b   :  { %686 = vmatpush3.bf16.msra.mxu1 %v722_v23 }
  0x2c   :  { %687 = vmatprep.subr.bf16.mxu1 %v750_v19 }
  0x2e   :  { %666 = vmatmul.mubr.msk.bf16.gmra.mrb[20].mxu0 %vm148_vm1, %v713_v13 }
  0x2f   :  { %669 = vmatprep.mubr.msk.bf16.mxu0 %vm148_vm1, %v714_v14  ;;  %688 = vmatpush3.bf16.msra.mxu1 %v723_v24 }
  0x30   :  { %689 = vmatprep.subr.bf16.mxu1 %v750_v19 }
  0x33   :  { %690 = vmatpush3.bf16.msra.mxu1 %v724_v25 }
  0x34   :  { %691 = vmatprep.subr.bf16.mxu1 %v750_v19 }
  0x36   :  { %670 = vmatmul.mubr.msk.bf16.gmra.mrb[24].mxu0 %vm148_vm1, %v715_v15 }
  0x37   :  { %673 = vmatprep.mubr.msk.bf16.mxu0 %vm148_vm1, %v716_v16  ;;  %692 = vmatpush3.bf16.msra.mxu1 %v725_v26 }
  0x3e   :  { %674 = vmatmul.mubr.msk.bf16.gmra.mrb[28].mxu0 %vm148_vm1, %v717_v17 }
  0xd9   :  { %v647_v28 = vpop.f32.mrb[0].mxu0 }
  0xda   :  { %v235_v29 = vpop.f32.mrb[1].mxu0  ;;  %v244_v33 = vadd.f32 %v647_v28, %v877_v27 }
  0xdb   :  { %v236_v30 = vadd.f32 %v877_v27, %v235_v29  ;;  %v648_v31 = vpop.f32.mrb[2].mxu0 }
  0xdc   :  { %v238_v32 = vpop.f32.mrb[3].mxu0  ;;  %v247_v36 = vadd.f32 %v648_v31, %v877_v27  ;;  %v364_v38 = vmax.f32 %v244_v33, 0.0 }
  0xdd   :  { %v239_v34 = vadd.f32 %v877_v27, %v238_v32  ;;  %v362_v35 = vmax.f32 %v236_v30, 0.0 }
  0xde   :  { %v365_v42 = vmax.f32 %v247_v36, 0.0 }
  0xdf   :  { %v363_v37 = vmax.f32 %v239_v34, 0.0 }
  0xe1   :  { %v394_v39 = vadd.f32 %v363_v37, %v362_v35  ;;  %v651_v40 = vpop.f32.mrb[4].mxu0 }
  0xe2   :  { %v251_v41 = vpop.f32.mrb[5].mxu0  ;;  %v260_v47 = vadd.f32 %v651_v40, %v877_v27 }
  0xe3   :  { %v395_v43 = vadd.f32 %v394_v39, %v364_v38  ;;  %v252_v44 = vadd.f32 %v877_v27, %v251_v41  ;;  %v652_v45 = vpop.f32.mrb[6].mxu0 }
  0xe4   :  { %v254_v46 = vpop.f32.mrb[7].mxu0  ;;  %v263_v52 = vadd.f32 %v652_v45, %v877_v27  ;;  %v368_v54 = vmax.f32 %v260_v47, 0.0 }
  0xe5   :  { %v366_v48 = vmax.f32 %v252_v44, 0.0  ;;  %v396_v49 = vadd.f32 %v395_v43, %v365_v42  ;;  %v255_v50 = vadd.f32 %v877_v27, %v254_v46 }
  0xe6   :  { %v369_v58 = vmax.f32 %v263_v52, 0.0 }
  0xe7   :  { %v397_v51 = vadd.f32 %v396_v49, %v366_v48  ;;  %v367_v53 = vmax.f32 %v255_v50, 0.0 }
  0xe9   :  { %v398_v55 = vadd.f32 %v397_v51, %v367_v53  ;;  %v655_v56 = vpop.f32.mrb[8].mxu0 }
  0xea   :  { %v267_v57 = vpop.f32.mrb[9].mxu0  ;;  %v276_v63 = vadd.f32 %v655_v56, %v877_v27 }
  0xeb   :  { %v399_v59 = vadd.f32 %v398_v55, %v368_v54  ;;  %v268_v60 = vadd.f32 %v877_v27, %v267_v57  ;;  %v656_v61 = vpop.f32.mrb[10].mxu0 }
  0xec   :  { %v270_v62 = vpop.f32.mrb[11].mxu0  ;;  %v279_v4 = vadd.f32 %v656_v61, %v877_v27  ;;  %v372_v6 = vmax.f32 %v276_v63, 0.0 }
  0xed   :  { %v370_v0 = vmax.f32 %v268_v60, 0.0  ;;  %v400_v1 = vadd.f32 %v399_v59, %v369_v58  ;;  %v271_v2 = vadd.f32 %v877_v27, %v270_v62 }
  0xee   :  { %v373_v10 = vmax.f32 %v279_v4, 0.0 }
  0xef   :  { %v401_v3 = vadd.f32 %v400_v1, %v370_v0  ;;  %v371_v5 = vmax.f32 %v271_v2, 0.0 }
  0xf1   :  { %v402_v7 = vadd.f32 %v401_v3, %v371_v5  ;;  %v659_v8 = vpop.f32.mrb[12].mxu0 }
  0xf2   :  { %v283_v9 = vpop.f32.mrb[13].mxu0  ;;  %v292_v15 = vadd.f32 %v659_v8, %v877_v27 }
  0xf3   :  { %v403_v11 = vadd.f32 %v402_v7, %v372_v6  ;;  %v284_v12 = vadd.f32 %v877_v27, %v283_v9  ;;  %v660_v13 = vpop.f32.mrb[14].mxu0 }
  0xf4   :  { %v286_v14 = vpop.f32.mrb[15].mxu0  ;;  %v295_v20 = vadd.f32 %v660_v13, %v877_v27  ;;  %v376_v22 = vmax.f32 %v292_v15, 0.0 }
  0xf5   :  { %v374_v16 = vmax.f32 %v284_v12, 0.0  ;;  %v404_v17 = vadd.f32 %v403_v11, %v373_v10  ;;  %v287_v18 = vadd.f32 %v877_v27, %v286_v14 }
  0xf6   :  { %v377_v26 = vmax.f32 %v295_v20, 0.0 }
  0xf7   :  { %v405_v19 = vadd.f32 %v404_v17, %v374_v16  ;;  %v375_v21 = vmax.f32 %v287_v18, 0.0 }
  0xf9   :  { %v406_v23 = vadd.f32 %v405_v19, %v375_v21  ;;  %v663_v24 = vpop.f32.mrb[16].mxu0 }
  0xfa   :  { %v299_v25 = vpop.f32.mrb[17].mxu0  ;;  %v308_v33 = vadd.f32 %v663_v24, %v877_v27 }
  0xfb   :  { %v407_v28 = vadd.f32 %v406_v23, %v376_v22  ;;  %v300_v29 = vadd.f32 %v877_v27, %v299_v25  ;;  %v664_v30 = vpop.f32.mrb[18].mxu0 }
  0xfc   :  { %v302_v31 = vpop.f32.mrb[19].mxu0  ;;  %v311_v36 = vadd.f32 %v664_v30, %v877_v27  ;;  %v380_v38 = vmax.f32 %v308_v33, 0.0 }
  0xfd   :  { %v408_v32 = vadd.f32 %v407_v28, %v377_v26  ;;  %v303_v34 = vadd.f32 %v877_v27, %v302_v31  ;;  %v378_v35 = vmax.f32 %v300_v29, 0.0 }
  0xfe   :  { %v381_v42 = vmax.f32 %v311_v36, 0.0 }
  0xff   :  { %v379_v37 = vmax.f32 %v303_v34, 0.0  ;;  %v409_v3 = vrot.slane %v408_v32, 4 }
 0x101   :  { %v415_v39 = vadd.f32 %v379_v37, %v378_v35  ;;  %v667_v40 = vpop.f32.mrb[20].mxu0  ;;  %v410_v11 = vadd.f32 %v409_v3, %v408_v32 }
 0x102   :  { %v315_v41 = vpop.f32.mrb[21].mxu0  ;;  %v324_v47 = vadd.f32 %v667_v40, %v877_v27 }
 0x103   :  { %v416_v43 = vadd.f32 %v415_v39, %v380_v38  ;;  %v316_v44 = vadd.f32 %v877_v27, %v315_v41  ;;  %v668_v45 = vpop.f32.mrb[22].mxu0  ;;  %v411_v21 = vrot.slane %v410_v11, 2 }
 0x104   :  { %v318_v46 = vpop.f32.mrb[23].mxu0  ;;  %v327_v52 = vadd.f32 %v668_v45, %v877_v27  ;;  %v384_v54 = vmax.f32 %v324_v47, 0.0  ;;  %v608_v47 = vld [vmem:[%s930_s4] ss:$0 sm:$0xff] }
 0x105   :  { %v382_v48 = vmax.f32 %v316_v44, 0.0  ;;  %v417_v49 = vadd.f32 %v416_v43, %v381_v42  ;;  %v319_v50 = vadd.f32 %v877_v27, %v318_v46  ;;  %v412_v28 = vadd.f32 %v411_v21, %v410_v11 }
 0x106   :  { %v385_v58 = vmax.f32 %v327_v52, 0.0 }
 0x107   :  { %v418_v51 = vadd.f32 %v417_v49, %v382_v48  ;;  %v383_v53 = vmax.f32 %v319_v50, 0.0  ;;  %v413_v33 = vrot.slane %v412_v28, 1 }
 0x109   :  { %v419_v55 = vadd.f32 %v418_v51, %v383_v53  ;;  %v671_v56 = vpop.f32.mrb[24].mxu0  ;;  %v414_v36 = vadd.f32 %v413_v33, %v412_v28 }
 0x10a   :  { %v331_v57 = vpop.f32.mrb[25].mxu0  ;;  %v340_v63 = vadd.f32 %v671_v56, %v877_v27 }
 0x10b   :  { %v420_v59 = vadd.f32 %v419_v55, %v384_v54  ;;  %v332_v60 = vadd.f32 %v877_v27, %v331_v57  ;;  %v672_v61 = vpop.f32.mrb[26].mxu0  ;;  %v436_v39 = vmul.f32 0.0078125, %v414_v36 }
 0x10c   :  { %v334_v62 = vpop.f32.mrb[27].mxu0  ;;  %v343_v5 = vadd.f32 %v672_v61, %v877_v27  ;;  %v388_v7 = vmax.f32 %v340_v63, 0.0 }
 0x10d   :  { %v386_v0 = vmax.f32 %v332_v60, 0.0  ;;  %v421_v1 = vadd.f32 %v420_v59, %v385_v58  ;;  %v335_v2 = vadd.f32 %v877_v27, %v334_v62  ;;  %v438_v42 = vpack.c.bf16 %v436_v39, %v436_v39 }
 0x10e   :  { %v389_v12 = vmax.f32 %v343_v5, 0.0 }
 0x10f   :  { %v422_v4 = vadd.f32 %v421_v1, %v386_v0  ;;  %v387_v6 = vmax.f32 %v335_v2, 0.0 }
 0x111   :  { %v423_v8 = vadd.f32 %v422_v4, %v387_v6  ;;  %v675_v9 = vpop.f32.mrb[28].mxu0 }
 0x112   :  { %v347_v10 = vpop.f32.mrb[29].mxu0  ;;  %v356_v17 = vadd.f32 %v675_v9, %v877_v27 }
 0x113   :  { %v424_v13 = vadd.f32 %v423_v8, %v388_v7  ;;  %v348_v14 = vadd.f32 %v877_v27, %v347_v10  ;;  %v676_v15 = vpop.f32.mrb[30].mxu0 }
 0x114   :  { %v350_v16 = vpop.f32.mrb[31].mxu0  ;;  %v359_v23 = vadd.f32 %v676_v15, %v877_v27  ;;  %v392_v25 = vmax.f32 %v356_v17, 0.0 }
 0x115   :  { %v390_v18 = vmax.f32 %v348_v14, 0.0  ;;  %v425_v19 = vadd.f32 %v424_v13, %v389_v12  ;;  %v351_v20 = vadd.f32 %v877_v27, %v350_v16  ;;  %v465_v27 = vunpack.c.l.b16 %v438_v42 }
 0x116   :  { %v393_v29 = vmax.f32 %v359_v23, 0.0 }
 0x117   :  { %v426_v22 = vadd.f32 %v425_v19, %v390_v18  ;;  %v391_v24 = vmax.f32 %v351_v20, 0.0 }
 0x119   :  { %v427_v26 = vadd.f32 %v426_v22, %v391_v24 }
 0x11b   :  { %v428_v30 = vadd.f32 %v427_v26, %v392_v25 }
 0x11d   :  { %v429_v31 = vadd.f32 %v428_v30, %v393_v29 }
 0x11f   :  { %v430_v32 = vrot.slane %v429_v31, 4 }
 0x121   :  { %v431_v34 = vadd.f32 %v430_v32, %v429_v31 }
 0x123   :  { %v432_v35 = vrot.slane %v431_v34, 2 }
 0x125   :  { %v433_v37 = vadd.f32 %v432_v35, %v431_v34 }
 0x127   :  { %v434_v38 = vrot.slane %v433_v37, 1 }
 0x129   :  { %v435_v40 = vadd.f32 %v434_v38, %v433_v37 }
 0x12b   :  { %v437_v41 = vmul.f32 0.0078125, %v435_v40 }
 0x12d   :  { %v439_v43 = vpack.c.bf16 %v437_v41, %v437_v41 }
 0x12f   :  { %v466_v44 = vunpack.c.l.b16 %v439_v43 }
 0x131   :  { %v468_v45 = vsel %vm467_vm3, %v466_v44, %v465_v27 }
 0x132   :  { %v469_v46 = vpack.c.b16 %v468_v45, %v468_v45 }
 0x134   :  { %694 = vmatmul.mubr.bf16.vlgmr.msra.gmra.mrb[0].mxu1 %v469_v46 }
 0x207   :  { %v553_v48 = vpop.f32.mrb[0].mxu1 }
 0x208   :  { %v554_v49 = vadd.f32 %v608_v47, %v553_v48  ;;  %v695_v50 = vpop.f32.mrb[1].mxu1 }
 0x209   :  { %v556_v51 = vpop.f32.mrb[2].mxu1 }
 0x20a   :  { %559 = vst [vmem:[#allocation2] sm:$0x3] %v554_v49  ;;  %v696_v52 = vpop.f32.mrb[3].mxu1 }
 0x20b   :  { %737 = shalt.err (!%p734_p4)
}
 0x20c   :  { %s738_s4 = scalar_lea.hbm %s931_s5, 32 }
 0x20d   :  { %p739_p5 = scmp.ne.s32.totalorder %s931_s5, %s738_s4  ;;  %p742_p6 = scmp.lt.u32.totalorder %s738_s4, %s931_s5 }
 0x20f   :  { %p744_p7 = pnand %p742_p6, %p739_p5 }
 0x211   :  { %747 = shalt.err (!%p744_p7)
}
 0x212   :  { %569 = dma.vmem_to_hbm [thread:$0]  %s567_s18, 32, %s931_s5, [#allocation3]  }
 0x213   :  { %748 = dma.done.wait [#allocation3], 32  }
 0x214   :  { %749 = vsyncadd [#allocation3], 4294967264 }
 0x215   :  { %573 = vsyncpa [#allocation3], 1 }

</bundles_post_ra>
